<compile_context>
chip_gen: v7x
topology: tpu7x:2x2x1
jax: 0.10.0
libtpu: 0.0.40
codegen_flags: <defaults>
</compile_context>

<pallas_src>
import jax
import jax.numpy as jnp
from jax import lax
from jax.experimental import pallas as pl
from jax.experimental.pallas import tpu as pltpu


def _embedder_kernel(h_ref, w1_ref, b1_ref, w2_ref, b2_ref, out_ref):
    m = h_ref.shape[0]
    d_mid = w1_ref.shape[0]          # 2 * embedding_size
    d_out = w2_ref.shape[0]          # num_arms (or num_barcodes)

    h = h_ref[...]

    # x = h @ W1^T + b1   (W1 kept in PyTorch (out, in) layout; contract last dims)
    x = lax.dot_general(
        h, w1_ref[...],
        (((1,), (1,)), ((), ())),
        preferred_element_type=jnp.float32,
    ) + b1_ref[...]

    # leaky_relu, negative_slope = 0.01 (PyTorch default), single VPU select
    lr = jnp.where(x > 0, x, jnp.float32(0.01) * x)

    # predicted_context = leaky_relu(x) @ W2^T + b2
    ctx = lax.dot_general(
        lr, w2_ref[...],
        (((1,), (1,)), ((), ())),
        preferred_element_type=jnp.float32,
    ) + b2_ref[...]

    # Pack both results into one lane-dense output slab:
    #   lanes [0, d_mid)            -> embedding (== x)
    #   lanes [d_mid, d_mid+d_out)  -> predicted_context
    #   remaining lanes             -> zero padding (keeps the slab fully defined)
    out_ref[:, :d_mid] = x.astype(out_ref.dtype)
    out_ref[:, d_mid:d_mid + d_out] = ctx.astype(out_ref.dtype)
    pad = out_ref.shape[1] - (d_mid + d_out)
    if pad:  # static Python int
        out_ref[:, d_mid + d_out:] = jnp.zeros((m, pad), out_ref.dtype)


def embedder_forward(h, w_h2m, b_h2m, w_e2c, b_e2c, *, block_m=512):
    """Embedder.forward as a single Pallas TPU kernel.

    h      : (..., input_dim)           -- leading dims are flattened into M
    w_h2m  : (2*embedding_size, input_dim)   PyTorch (out, in) layout
    b_h2m  : (2*embedding_size,)
    w_e2c  : (num_arms, 2*embedding_size)    PyTorch (out, in) layout
    b_e2c  : (num_arms,)

    Returns (embedding (..., 2*emb), predicted_context (..., num_arms)).
    """
    lead = h.shape[:-1]
    d_in = h.shape[-1]
    d_mid = w_h2m.shape[0]
    d_out = w_e2c.shape[0]

    h2 = h.reshape(-1, d_in)          # flatten batch/sequence dims into M
    m = h2.shape[0]

    # Lane-dense packed output width: round (d_mid + d_out) up to a multiple of 128.
    slab = max(128, ((d_mid + d_out + 127) // 128) * 128)

    # Biases as (1, D) rows for clean 2-D broadcast in VMEM (tiny, trivial reshape).
    b1 = b_h2m.reshape(1, d_mid)
    b2 = b_e2c.reshape(1, d_out)

    vmem = pltpu.MemorySpace.VMEM

    if m <= block_m:
        # Gridless: everything fits in VMEM in one shot; single kernel invocation.
        packed = pl.pallas_call(
            _embedder_kernel,
            out_shape=jax.ShapeDtypeStruct((m, slab), h.dtype),
            in_specs=[
                pl.BlockSpec(memory_space=vmem),   # h
                pl.BlockSpec(memory_space=vmem),   # w_h2m (out, in)
                pl.BlockSpec(memory_space=vmem),   # b_h2m (1, d_mid)
                pl.BlockSpec(memory_space=vmem),   # w_e2c (out, in)
                pl.BlockSpec(memory_space=vmem),   # b_e2c (1, d_out)
            ],
            out_specs=pl.BlockSpec(memory_space=vmem),
        )(h2, w_h2m, b1, w_e2c, b2)
    else:
        # Tile over M so the auto-pipeline overlaps HBM <-> VMEM traffic with
        # compute.  Weights/biases are tiny and stay resident every grid step.
        m_pad = pl.cdiv(m, block_m) * block_m
        hp = jnp.pad(h2, ((0, m_pad - m), (0, 0))) if m_pad != m else h2
        packed = pl.pallas_call(
            _embedder_kernel,
            out_shape=jax.ShapeDtypeStruct((m_pad, slab), h.dtype),
            grid_spec=pltpu.PrefetchScalarGridSpec(
                num_scalar_prefetch=0,
                grid=(m_pad // block_m,),
                in_specs=[
                    pl.BlockSpec((block_m, d_in), lambda i: (i, 0)),
                    pl.BlockSpec((d_mid, d_in), lambda i: (0, 0)),
                    pl.BlockSpec((1, d_mid), lambda i: (0, 0)),
                    pl.BlockSpec((d_out, d_mid), lambda i: (0, 0)),
                    pl.BlockSpec((1, d_out), lambda i: (0, 0)),
                ],
                out_specs=pl.BlockSpec((block_m, slab), lambda i: (i, 0)),
            ),
            compiler_params=pltpu.CompilerParams(
                dimension_semantics=("parallel",)),
        )(hp, w_h2m, b1, w_e2c, b2)
        packed = packed[:m]

    embedding = packed[:, :d_mid].reshape(*lead, d_mid)
    predicted_context = packed[:, d_mid:d_mid + d_out].reshape(*lead, d_out)
    return embedding, predicted_context


if __name__ == "__main__":
    # exp_settings (synthetic, small):
    #   dim_hidden_lstm = 32, embedding_size = 32, num_arms = 8,
    #   embedder_arm_trained = True  -> e2c: Linear(64 -> 8)
    dim_hidden_lstm = 32
    embedding_size = 32
    num_arms = 8
    batch = 2

    key = jax.random.PRNGKey(0)
    k_h, k_w1, k_w2 = jax.random.split(key, 3)

    h = jax.random.normal(k_h, (batch, dim_hidden_lstm), dtype=jnp.float32)

    # PyTorch param shapes: h2m.weight (2*emb, in), e2c.weight (num_arms, 2*emb);
    # orthogonal_ weights, zero biases (matches reset_parameter()).
    w_h2m = jax.nn.initializers.orthogonal()(
        k_w1, (2 * embedding_size, dim_hidden_lstm), jnp.float32)
    b_h2m = jnp.zeros((2 * embedding_size,), jnp.float32)
    w_e2c = jax.nn.initializers.orthogonal()(
        k_w2, (num_arms, 2 * embedding_size), jnp.float32)
    b_e2c = jnp.zeros((num_arms,), jnp.float32)

    # Pure-JAX reference
    def ref_fwd(hh):
        x_ref = hh @ w_h2m.T + b_h2m
        ctx_ref = jnp.where(x_ref > 0, x_ref, 0.01 * x_ref) @ w_e2c.T + b_e2c
        return x_ref, ctx_ref

    # --- small-batch (gridless VMEM-resident) path ---
    embedding, predicted_context = embedder_forward(h, w_h2m, b_h2m, w_e2c, b_e2c)
    jax.block_until_ready((embedding, predicted_context))
    x_ref, ctx_ref = ref_fwd(h)
    assert embedding.shape == (batch, 2 * embedding_size)
    assert predicted_context.shape == (batch, num_arms)
    assert jnp.allclose(embedding, x_ref, atol=1e-5)
    assert jnp.allclose(predicted_context, ctx_ref, atol=1e-5)

    # --- exercise the M-tiled (pipelined) path with a small grid ---
    h_big = jax.random.normal(jax.random.PRNGKey(1), (20, dim_hidden_lstm),
                              dtype=jnp.float32)
    emb_b, ctx_b = embedder_forward(h_big, w_h2m, b_h2m, w_e2c, b_e2c, block_m=8)
    jax.block_until_ready((emb_b, ctx_b))
    x_ref_b, ctx_ref_b = ref_fwd(h_big)
    assert jnp.allclose(emb_b, x_ref_b, atol=1e-5)
    assert jnp.allclose(ctx_b, ctx_ref_b, atol=1e-5)

    print("KERNEL_OK")
</pallas_src>

<mosaic_0001>
module attributes {stable_mosaic.version = 11 : i64} {
  func.func @_embedder_kernel(%arg0: memref<2x32xf32, #tpu.memory_space<vmem>>, %arg1: memref<64x32xf32, #tpu.memory_space<vmem>>, %arg2: memref<1x64xf32, #tpu.memory_space<vmem>>, %arg3: memref<8x64xf32, #tpu.memory_space<vmem>>, %arg4: memref<1x8xf32, #tpu.memory_space<vmem>>, %arg5: memref<2x128xf32, #tpu.memory_space<vmem>>) attributes {dimension_semantics = [], scalar_prefetch = 0 : i64, scratch_operands = 0 : i64, tpu.core_type = #tpu.core_type<tc>} {
    %c0 = arith.constant 0 : index
    %c0_0 = arith.constant 0 : index
    %0 = vector.load %arg0[%c0, %c0_0] : memref<2x32xf32, #tpu.memory_space<vmem>>, vector<2x32xf32>
    %c0_1 = arith.constant 0 : index
    %c0_2 = arith.constant 0 : index
    %1 = vector.load %arg1[%c0_1, %c0_2] : memref<64x32xf32, #tpu.memory_space<vmem>>, vector<64x32xf32>
    %cst = arith.constant dense<0.000000e+00> : vector<2x64xf32>
    %2 = tpu.matmul %0, %1, %cst {dimension_numbers = #tpu.dot_dimension_numbers<[1], [1], [0], [0], [0, 0, 1, 0], [], []>} : vector<2x32xf32>, vector<64x32xf32>, vector<2x64xf32> -> vector<2x64xf32>
    %c0_3 = arith.constant 0 : index
    %c0_4 = arith.constant 0 : index
    %3 = vector.load %arg2[%c0_3, %c0_4] : memref<1x64xf32, #tpu.memory_space<vmem>>, vector<1x64xf32>
    %4 = vector.broadcast %3 : vector<1x64xf32> to vector<2x64xf32>
    %5 = arith.addf %2, %4 : vector<2x64xf32>
    %cst_5 = arith.constant 0.000000e+00 : f32
    %6 = vector.broadcast %cst_5 : f32 to vector<2x64xf32>
    %7 = arith.cmpf ogt, %5, %6 : vector<2x64xf32>
    %cst_6 = arith.constant 0.00999999977 : f32
    %8 = vector.broadcast %cst_6 : f32 to vector<2x64xf32>
    %9 = arith.mulf %8, %5 : vector<2x64xf32>
    %10 = arith.select %7, %5, %9 : vector<2x64xi1>, vector<2x64xf32>
    %c0_7 = arith.constant 0 : index
    %c0_8 = arith.constant 0 : index
    %11 = vector.load %arg3[%c0_7, %c0_8] : memref<8x64xf32, #tpu.memory_space<vmem>>, vector<8x64xf32>
    %cst_9 = arith.constant dense<0.000000e+00> : vector<2x8xf32>
    %12 = tpu.matmul %10, %11, %cst_9 {dimension_numbers = #tpu.dot_dimension_numbers<[1], [1], [0], [0], [0, 0, 1, 0], [], []>} : vector<2x64xf32>, vector<8x64xf32>, vector<2x8xf32> -> vector<2x8xf32>
    %c0_10 = arith.constant 0 : index
    %c0_11 = arith.constant 0 : index
    %13 = vector.load %arg4[%c0_10, %c0_11] : memref<1x8xf32, #tpu.memory_space<vmem>>, vector<1x8xf32>
    %14 = vector.broadcast %13 : vector<1x8xf32> to vector<2x8xf32>
    %15 = arith.addf %12, %14 : vector<2x8xf32>
    %c0_12 = arith.constant 0 : index
    %c0_13 = arith.constant 0 : index
    %16 = vector.load %arg5[%c0_12, %c0_13] : memref<2x128xf32, #tpu.memory_space<vmem>>, vector<2x64xf32>
    tpu.vector_store %arg5[%c0_12, %c0_13], %5 {strides = array<i32>} : memref<2x128xf32, #tpu.memory_space<vmem>>, vector<2x64xf32>,
    %c0_14 = arith.constant 0 : index
    %c64 = arith.constant 64 : index
    %17 = vector.load %arg5[%c0_14, %c64] : memref<2x128xf32, #tpu.memory_space<vmem>>, vector<2x8xf32>
    tpu.vector_store %arg5[%c0_14, %c64], %15 {strides = array<i32>} : memref<2x128xf32, #tpu.memory_space<vmem>>, vector<2x8xf32>,
    %cst_15 = arith.constant 0.000000e+00 : f32
    %18 = vector.broadcast %cst_15 : f32 to vector<2x56xf32>
    %c0_16 = arith.constant 0 : index
    %c72 = arith.constant 72 : index
    %19 = vector.load %arg5[%c0_16, %c72] : memref<2x128xf32, #tpu.memory_space<vmem>>, vector<2x56xf32>
    tpu.vector_store %arg5[%c0_16, %c72], %18 {strides = array<i32>} : memref<2x128xf32, #tpu.memory_space<vmem>>, vector<2x56xf32>,
    return
  }
}

</mosaic_0001>

<bundles_post_ra>
// kernel: tpu_custom_call.1
= control target key start
LH: loop header
LB: loop body
LE: loop exit
PB: predicated region body
PF: predicated region fallthrough
CT: control target
= control target key end

     0   :  { %vm37_vm0 = vcmask 261120   ;;  %v340_v2 = vmov 0.0|0.0   ;;  %vm341_vm2 = vmmov 0   ;;  %v342_v5 = vmov 0.0   ;;  %s438_s0 = inlined_call_operand.vmem [shape: f32[2,32], index: 0, kind: input, shape index: {}]   ;;  %s439_s1 = inlined_call_operand.vmem [shape: f32[64,32], index: 1, kind: input, shape index: {}]   ;;  %s440_s2 = inlined_call_operand.vmem [shape: f32[1,64], index: 2, kind: input, shape index: {}]   ;;  %s441_s3 = inlined_call_operand.vmem [shape: f32[8,64], index: 3, kind: input, shape index: {}]   ;;  %s442_s4 = inlined_call_operand.vmem [shape: f32[1,8], index: 4, kind: input, shape index: {}]   ;;  %s443_s5 = inlined_call_operand.hbm [shape: f32[2,128], index: 5, kind: output, shape index: {}]  }
   0x1   :  { %v22_v0 = vld [vmem:[%s439_s1] sm:$0xff]  ;;  %v23_v1 = vld [vmem:[%s439_s1 + $0x8] sm:$0xff]  ;;  %295 = vmatprep.subr.bf16.mxu0 %v340_v2  ;;  %vm383_vm1 = vmpackc.low %vm37_vm0, %vm37_vm0  ;;  %287 = vmatprep.mubr.msk.f32.mxu0 %vm341_vm2, %v342_v5 }
   0x2   :  { %v296_v3 = vpack.c.bf16 %v23_v1, %v22_v0  ;;  %290 = vmatprep.subr.mxu1 %v342_v5  ;;  %292 = vmatprep.mubr.msk.f32.mxu1 %vm341_vm2, %v342_v5 }
   0x4   :  { %298 = vmatpush3.bf16.xpose.msk.msra.mxu0 %vm383_vm1, %v296_v3 }
   0x5   :  { %10 = vsyncpa [#allocation3], 0  ;;  %299 = vmatprep.subr.bf16.mxu0 %v340_v2  ;;  %v24_v6 = vld [vmem:[%s439_s1 + $0x10] sm:$0xff]  ;;  %v25_v7 = vld [vmem:[%s439_s1 + $0x18] sm:$0xff]  ;;  %vm146_vm3 = vcmask 523264   ;;  %vm223_vm4 = vcmask 517120  }
   0x6   :  { %v300_v8 = vpack.c.bf16 %v25_v7, %v24_v6  ;;  %v26_v9 = vld [vmem:[%s439_s1 + $0x20] sm:$0xff]  ;;  %v27_v10 = vld [vmem:[%s439_s1 + $0x28] sm:$0xff]  ;;  %v28_v12 = vld [vmem:[%s439_s1 + $0x30] sm:$0xff]  ;;  %s344_s15 = smov [#allocation2]   ;;  %vm229_vm6 = vcmask 583168   ;;  %vm231_vm7 = vcmask 1041984  }
   0x7   :  { %v304_v11 = vpack.c.bf16 %v27_v10, %v26_v9  ;;  %v29_v13 = vld [vmem:[%s439_s1 + $0x38] sm:$0xff]  ;;  %v21_v15 = vld [vmem:[%s438_s0] sm:$0x3] }
   0x8   :  { %v308_v14 = vpack.c.bf16 %v29_v13, %v28_v12  ;;  %v138_v16 = vld [vmem:[%s441_s3] sm:$0xff]  ;;  %s343_s3 = smov 64  }
   0x9   :  { %291 = vmatpush3.xpose.msk.msra.mxu1 %vm146_vm3, %v138_v16  ;;  %v247_v17 = vld [vmem:[%s440_s2] ss:$0 sm:$0xff]  ;;  %s239_s2 = sshll.u32 %s344_s15, 4  ;;  %s240_s2 = int_to_ptr.vmem [resolvable:$true] %s239_s2 }
   0xa   :  { %v257_v23 = vld [vmem:[%s442_s4] ss:$0 sm:$0xff]  ;;  %s316_s16 = scalar_lea.vmem %s240_s2, 32  ;;  %p321_p1 = scmp.lt.s32.totalorder %s240_s2, %s240_s2 }
   0xb   :  { %p317_p0 = scmp.ne.s32.totalorder %s240_s2, %s316_s16  ;;  %p322_p2 = scmp.lt.s32.totalorder %s316_s16, %s316_s16 }
   0xc   :  { %302 = vmatpush3.bf16.xpose.msk.msra.mxu0 %vm383_vm1, %v300_v8 }
   0xd   :  { %303 = vmatprep.subr.bf16.mxu0 %v340_v2  ;;  %p323_p3 = por %p322_p2, %p321_p1 }
   0xf   :  { %p324_p4 = pnand %p323_p3, %p317_p0 }
  0x14   :  { %306 = vmatpush3.bf16.xpose.msk.msra.mxu0 %vm383_vm1, %v304_v11 }
  0x15   :  { %307 = vmatprep.subr.bf16.mxu0 %v340_v2 }
  0x1c   :  { %310 = vmatpush3.bf16.xpose.msk.msra.mxu0 %vm383_vm1, %v308_v14 }
  0x23   :  { %288 = vmatmul.mubr.msk.f32.vlgmr.msra.gmra.mrb[0].mxu0 %vm37_vm0, %v21_v15 }
  0xf6   :  { %v131_v18 = vpop.f32.mrb[0].mxu0 }
  0xf7   :  { %v132_v19 = vadd.f32 %v247_v17, %v131_v18  ;;  %v289_v20 = vpop.f32.mrb[1].mxu0 }
  0xf9   :  { %vm135_vm5 = vcmp.gt.f32.partialorder %v132_v19, 0.0  ;;  %v136_v21 = vmul.f32 0.01, %v132_v19  ;;  %224 = vst.msk [vmem:[#allocation2] sm:$0x3] %vm223_vm4, %v132_v19 }
  0xfb   :  { %v137_v22 = vsel %vm135_vm5, %v132_v19, %v136_v21 }
  0xfc   :  { %293 = vmatmul.mubr.msk.f32.vlgmr.msra.gmra.mrb[0].mxu1 %vm146_vm3, %v137_v22 }
 0x1cf   :  { %v219_v24 = vpop.f32.mrb[0].mxu1 }
 0x1d0   :  { %v220_v25 = vadd.f32 %v257_v23, %v219_v24  ;;  %v294_v26 = vpop.f32.mrb[1].mxu1 }
 0x1d2   :  { %226 = vrot.lane.b32.xlu0 %v220_v25, %s343_s3 }
 0x244   :  { %v227_v27 = vpop.permute.xlu0 %226 }
 0x245   :  { %230 = vst.msk [vmem:[#allocation2] sm:$0x3] %vm229_vm6, %v227_v27 }
 0x246   :  { %232 = vst.msk [vmem:[#allocation2] sm:$0x3] %vm231_vm7, %v342_v5 }
 0x247   :  { %327 = shalt.err (!%p324_p4)
}
 0x248   :  { %s328_s18 = scalar_lea.hbm %s443_s5, 32 }
 0x249   :  { %p329_p5 = scmp.ne.s32.totalorder %s443_s5, %s328_s18  ;;  %p332_p6 = scmp.lt.u32.totalorder %s328_s18, %s443_s5 }
 0x24b   :  { %p334_p7 = pnand %p332_p6, %p329_p5 }
 0x24d   :  { %337 = shalt.err (!%p334_p7)
}
 0x24e   :  { %242 = dma.vmem_to_hbm [thread:$0]  %s240_s2, 32, %s443_s5, [#allocation3]  }
 0x24f   :  { %338 = dma.done.wait [#allocation3], 32  }
 0x250   :  { %339 = vsyncadd [#allocation3], 4294967264 }
 0x251   :  { %246 = vsyncpa [#allocation3], 1 }

</bundles_post_ra>
